<compile_context>
chip_gen: v6e
topology: v6e:2x2x1
jax: 0.10.0
libtpu: 0.0.40
codegen_flags: <defaults>
</compile_context>

<pallas_src>
import jax
import jax.numpy as jnp
from jax.experimental import pallas as pl
from jax.experimental.pallas import tpu as pltpu


def _round_up(x, m):
    return (x + m - 1) // m * m


def ffn_kernel(x_ref, w1_ref, b1_ref, w2_ref, b2_ref, o_ref, acc_ref):
    """One (row-tile i, hidden-chunk k) step of y = relu(x @ W1 + b1) @ W2 + b2.

    x_ref  : (tm, Dp)  bf16  row tile (resident across the U axis)
    w1_ref : (Dp, tu)  bf16  chunk of W1 columns
    b1_ref : (1,  tu)  f32
    w2_ref : (tu, Dp)  bf16  chunk of W2 rows
    b2_ref : (1,  Dp)  f32
    o_ref  : (tm, Dp)  output tile (written on the last U chunk)
    acc_ref: (tm, Dp)  f32 VMEM accumulator
    """
    k = pl.program_id(1)

    @pl.when(k == 0)
    def _():
        acc_ref[...] = jnp.zeros_like(acc_ref)

    # First matmul on the MXU (bf16 in, f32 accumulate); bias + ReLU in f32.
    h = jnp.dot(x_ref[...], w1_ref[...], preferred_element_type=jnp.float32)
    h = jnp.maximum(h + b1_ref[...], 0.0)

    # Second matmul: cast the activation chunk to bf16 for the MXU, keep the
    # running sum in the f32 scratch accumulator.
    acc_ref[...] += jnp.dot(
        h.astype(w2_ref.dtype), w2_ref[...], preferred_element_type=jnp.float32
    )

    @pl.when(k == pl.num_programs(1) - 1)
    def _():
        o_ref[...] = (acc_ref[...] + b2_ref[...]).astype(o_ref.dtype)


def feed_forward(x, w1, b1, w2, b2, *, tm=512, tu=512):
    """x: (B, S, D); w1: (D, U); b1: (U,); w2: (U, D); b2: (D,).

    Weights are pre-transposed relative to torch.nn.Linear (W1: (D, U),
    W2: (U, D)) so the kernel does plain row-major matmuls.
    """
    B, S, D = x.shape
    U = w1.shape[1]
    M = B * S
    out_dtype = x.dtype
    out_itemsize = jnp.dtype(out_dtype).itemsize

    # --- Lane-dense / tile-aligned padded shapes --------------------------
    Dp = _round_up(D, 128)            # lane-dense output & contraction dims
    Up = _round_up(U, 128)
    tu = min(tu, Up)                  # tu is a multiple of 128 by construction
    Up = _round_up(Up, tu)            # make the hidden grid axis exact

    Mp = _round_up(M, 8)
    tm = min(tm, Mp)                  # shrink for tiny problems
    Mp = _round_up(Mp, tm)

    # --- Zero-pad inputs (exact for matmul+bias+ReLU; pad sliced off below) --
    def pad2(a, rows, cols, dtype):
        a = a.astype(dtype)
        return jnp.pad(a, ((0, rows - a.shape[0]), (0, cols - a.shape[1])))

    xp = pad2(x.reshape(M, D), Mp, Dp, jnp.bfloat16)
    w1p = pad2(w1, Dp, Up, jnp.bfloat16)
    w2p = pad2(w2, Up, Dp, jnp.bfloat16)
    b1p = pad2(b1.reshape(1, U), 1, Up, jnp.float32)
    b2p = pad2(b2.reshape(1, D), 1, Dp, jnp.float32)

    grid = (Mp // tm, Up // tu)

    # --- VMEM budget (double-buffered blocks + f32 accumulator) -----------
    block_bytes = (
        2 * (tm * Dp * 2)        # x tile (bf16)
        + 2 * (Dp * tu * 2)      # W1 chunk (bf16)
        + 2 * (tu * 4)           # b1 chunk (f32)
        + 2 * (tu * Dp * 2)      # W2 chunk (bf16)
        + 2 * (Dp * 4)           # b2 (f32)
        + 2 * (tm * Dp * out_itemsize)  # output tile
        + tm * Dp * 4            # accumulator scratch (f32)
    )
    vmem_limit = max(32 << 20, min(int(block_bytes * 1.3) + (2 << 20), 100 << 20))

    cost = pl.CostEstimate(
        flops=4 * M * D * U,          # two matmuls: 2*M*D*U each
        transcendentals=0,
        bytes_accessed=int(
            M * D * 2 + D * U * 2 + U * 4 + U * D * 2 + D * 4 + M * D * out_itemsize
        ),
    )

    out_p = pl.pallas_call(
        ffn_kernel,
        out_shape=jax.ShapeDtypeStruct((Mp, Dp), out_dtype),
        grid_spec=pltpu.PrefetchScalarGridSpec(
            num_scalar_prefetch=0,
            grid=grid,
            in_specs=[
                pl.BlockSpec((tm, Dp), lambda i, k: (i, 0)),  # x rows (held across k)
                pl.BlockSpec((Dp, tu), lambda i, k: (0, k)),  # W1 column chunk
                pl.BlockSpec((1, tu), lambda i, k: (0, k)),   # b1 chunk
                pl.BlockSpec((tu, Dp), lambda i, k: (k, 0)),  # W2 row chunk
                pl.BlockSpec((1, Dp), lambda i, k: (0, 0)),   # b2 (constant)
            ],
            out_specs=pl.BlockSpec((tm, Dp), lambda i, k: (i, 0)),
            scratch_shapes=[pltpu.VMEM((tm, Dp), jnp.float32)],
        ),
        compiler_params=pltpu.CompilerParams(
            dimension_semantics=("parallel", "arbitrary"),
            vmem_limit_bytes=vmem_limit,
        ),
        cost_estimate=cost,
    )(xp, w1p, b1p, w2p, b2p)

    return out_p[:M, :D].reshape(B, S, D)


if __name__ == "__main__":
    # Small shapes consistent with the module (dim_model=128, units=256).
    B, S, D, U = 2, 8, 128, 256

    key = jax.random.PRNGKey(0)
    kx, kw1, kb1, kw2, kb2 = jax.random.split(key, 5)

    x = jax.random.normal(kx, (B, S, D), dtype=jnp.float32)
    # Deterministic init mimicking nn.Linear's uniform(-1/sqrt(fan_in), 1/sqrt(fan_in)).
    w1 = jax.random.uniform(kw1, (D, U), jnp.float32, -1.0, 1.0) / jnp.sqrt(D)
    b1 = jax.random.uniform(kb1, (U,), jnp.float32, -1.0, 1.0) / jnp.sqrt(D)
    w2 = jax.random.uniform(kw2, (U, D), jnp.float32, -1.0, 1.0) / jnp.sqrt(U)
    b2 = jax.random.uniform(kb2, (D,), jnp.float32, -1.0, 1.0) / jnp.sqrt(U)

    out = feed_forward(x, w1, b1, w2, b2)
    jax.block_until_ready(out)
    assert out.shape == (B, S, D)
    assert out.dtype == x.dtype

    # Reference that mirrors the kernel's mixed precision (bf16 MXU inputs,
    # f32 accumulation, f32 bias/ReLU).
    xb = x.reshape(B * S, D).astype(jnp.bfloat16)
    w1b = w1.astype(jnp.bfloat16)
    w2b = w2.astype(jnp.bfloat16)
    h = jnp.maximum(jnp.dot(xb, w1b, preferred_element_type=jnp.float32) + b1, 0.0)
    ref = (
        jnp.dot(h.astype(jnp.bfloat16), w2b, preferred_element_type=jnp.float32) + b2
    ).reshape(B, S, D)
    assert jnp.allclose(out, ref.astype(out.dtype), atol=5e-3, rtol=5e-3)

    # Loose sanity check against exact f32 math (only bf16 rounding differs).
    ref_f32 = jnp.maximum(x @ w1 + b1, 0.0) @ w2 + b2
    assert jnp.allclose(out, ref_f32, atol=5e-2, rtol=5e-2)

    print("KERNEL_OK")
</pallas_src>

<mosaic_0001>
module attributes {stable_mosaic.version = 11 : i64} {
  func.func @ffn_kernel(%arg0: i32, %arg1: i32, %arg2: memref<16x128xbf16, #tpu.memory_space<vmem>>, %arg3: memref<128x256xbf16, #tpu.memory_space<vmem>>, %arg4: memref<1x256xf32, #tpu.memory_space<vmem>>, %arg5: memref<256x128xbf16, #tpu.memory_space<vmem>>, %arg6: memref<1x128xf32, #tpu.memory_space<vmem>>, %arg7: memref<16x128xf32, #tpu.memory_space<vmem>>, %arg8: memref<16x128xf32, #tpu.memory_space<vmem>>) attributes {dimension_semantics = [#tpu.dimension_semantics<parallel>, #tpu.dimension_semantics<arbitrary>], iteration_bounds = array<i64: 1, 1>, scalar_prefetch = 0 : i64, scratch_operands = 1 : i64, tpu.core_type = #tpu.core_type<tc>, window_params = [{transform_indices = @transform_0, window_bounds = array<i64: 16, 128>}, {transform_indices = @transform_1, window_bounds = array<i64: 128, 256>}, {transform_indices = @transform_2, window_bounds = array<i64: 1, 256>}, {transform_indices = @transform_3, window_bounds = array<i64: 256, 128>}, {pipeline_mode = #tpu.pipeline_mode<synchronous>, transform_indices = @transform_4, window_bounds = array<i64: 1, 128>}, {transform_indices = @transform_5, window_bounds = array<i64: 16, 128>}]} {
    %c0_i32 = arith.constant 0 : i32
    %0 = arith.cmpi eq, %arg1, %c0_i32 : i32
    %1 = arith.extui %0 : i1 to i32
    %c0_i32_0 = arith.constant 0 : i32
    %2 = arith.cmpi ne, %1, %c0_i32_0 : i32
    scf.if %2 {
      %cst_16 = arith.constant 0.000000e+00 : f32
      %20 = vector.broadcast %cst_16 : f32 to vector<16x128xf32>
      %c0_17 = arith.constant 0 : index
      %c0_18 = arith.constant 0 : index
      %21 = vector.load %arg8[%c0_17, %c0_18] : memref<16x128xf32, #tpu.memory_space<vmem>>, vector<16x128xf32>
      tpu.vector_store %arg8[%c0_17, %c0_18], %20 {strides = array<i32>} : memref<16x128xf32, #tpu.memory_space<vmem>>, vector<16x128xf32>,
    } else {
    }
    %c0 = arith.constant 0 : index
    %c0_1 = arith.constant 0 : index
    %3 = vector.load %arg2[%c0, %c0_1] : memref<16x128xbf16, #tpu.memory_space<vmem>>, vector<16x128xbf16>
    %c0_2 = arith.constant 0 : index
    %c0_3 = arith.constant 0 : index
    %4 = vector.load %arg3[%c0_2, %c0_3] : memref<128x256xbf16, #tpu.memory_space<vmem>>, vector<128x256xbf16>
    %cst = arith.constant dense<0.000000e+00> : vector<16x256xf32>
    %5 = tpu.matmul %3, %4, %cst {dimension_numbers = #tpu.dot_dimension_numbers<[1], [0], [0], [1], [0, 0, 1, 1], [], []>} : vector<16x128xbf16>, vector<128x256xbf16>, vector<16x256xf32> -> vector<16x256xf32>
    %c0_4 = arith.constant 0 : index
    %c0_5 = arith.constant 0 : index
    %6 = vector.load %arg4[%c0_4, %c0_5] : memref<1x256xf32, #tpu.memory_space<vmem>>, vector<1x256xf32>
    %7 = vector.broadcast %6 : vector<1x256xf32> to vector<16x256xf32>
    %8 = arith.addf %5, %7 : vector<16x256xf32>
    %cst_6 = arith.constant 0.000000e+00 : f32
    %9 = vector.broadcast %cst_6 : f32 to vector<16x256xf32>
    %10 = arith.maximumf %8, %9 : vector<16x256xf32>
    %c0_7 = arith.constant 0 : index
    %c0_8 = arith.constant 0 : index
    %11 = vector.load %arg8[%c0_7, %c0_8] : memref<16x128xf32, #tpu.memory_space<vmem>>, vector<16x128xf32>
    %12 = arith.truncf %10 : vector<16x256xf32> to vector<16x256xbf16>
    %c0_9 = arith.constant 0 : index
    %c0_10 = arith.constant 0 : index
    %13 = vector.load %arg5[%c0_9, %c0_10] : memref<256x128xbf16, #tpu.memory_space<vmem>>, vector<256x128xbf16>
    %cst_11 = arith.constant dense<0.000000e+00> : vector<16x128xf32>
    %14 = tpu.matmul %12, %13, %cst_11 {dimension_numbers = #tpu.dot_dimension_numbers<[1], [0], [0], [1], [0, 0, 1, 1], [], []>} : vector<16x256xbf16>, vector<256x128xbf16>, vector<16x128xf32> -> vector<16x128xf32>
    %15 = arith.addf %11, %14 : vector<16x128xf32>
    %c0_12 = arith.constant 0 : index
    %c0_13 = arith.constant 0 : index
    %16 = vector.load %arg8[%c0_12, %c0_13] : memref<16x128xf32, #tpu.memory_space<vmem>>, vector<16x128xf32>
    tpu.vector_store %arg8[%c0_12, %c0_13], %15 {strides = array<i32>} : memref<16x128xf32, #tpu.memory_space<vmem>>, vector<16x128xf32>,
    %c0_i32_14 = arith.constant 0 : i32
    %17 = arith.cmpi eq, %arg1, %c0_i32_14 : i32
    %18 = arith.extui %17 : i1 to i32
    %c0_i32_15 = arith.constant 0 : i32
    %19 = arith.cmpi ne, %18, %c0_i32_15 : i32
    scf.if %19 {
      %c0_16 = arith.constant 0 : index
      %c0_17 = arith.constant 0 : index
      %20 = vector.load %arg8[%c0_16, %c0_17] : memref<16x128xf32, #tpu.memory_space<vmem>>, vector<16x128xf32>
      %c0_18 = arith.constant 0 : index
      %c0_19 = arith.constant 0 : index
      %21 = vector.load %arg6[%c0_18, %c0_19] : memref<1x128xf32, #tpu.memory_space<vmem>>, vector<1x128xf32>
      %22 = vector.broadcast %21 : vector<1x128xf32> to vector<16x128xf32>
      %23 = arith.addf %20, %22 : vector<16x128xf32>
      %c0_20 = arith.constant 0 : index
      %c0_21 = arith.constant 0 : index
      %24 = vector.load %arg7[%c0_20, %c0_21] : memref<16x128xf32, #tpu.memory_space<vmem>>, vector<16x128xf32>
      tpu.vector_store %arg7[%c0_20, %c0_21], %23 {strides = array<i32>} : memref<16x128xf32, #tpu.memory_space<vmem>>, vector<16x128xf32>,
    } else {
    }
    return
  }
  func.func @transform_0(%arg0: i32, %arg1: i32) -> (i32, i32) {
    %c0_i32 = arith.constant 0 : i32
    %c0_i32_0 = arith.constant 0 : i32
    return %arg0, %c0_i32 : i32, i32
  }
  func.func @transform_1(%arg0: i32, %arg1: i32) -> (i32, i32) {
    %c0_i32 = arith.constant 0 : i32
    %c0_i32_0 = arith.constant 0 : i32
    return %c0_i32, %arg1 : i32, i32
  }
  func.func @transform_2(%arg0: i32, %arg1: i32) -> (i32, i32) {
    %c0_i32 = arith.constant 0 : i32
    %c0_i32_0 = arith.constant 0 : i32
    return %c0_i32, %arg1 : i32, i32
  }
  func.func @transform_3(%arg0: i32, %arg1: i32) -> (i32, i32) {
    %c0_i32 = arith.constant 0 : i32
    %c0_i32_0 = arith.constant 0 : i32
    return %arg1, %c0_i32 : i32, i32
  }
  func.func @transform_4(%arg0: i32, %arg1: i32) -> (i32, i32) {
    %c0_i32 = arith.constant 0 : i32
    %c0_i32_0 = arith.constant 0 : i32
    %c0_i32_1 = arith.constant 0 : i32
    return %c0_i32, %c0_i32_0 : i32, i32
  }
  func.func @transform_5(%arg0: i32, %arg1: i32) -> (i32, i32) {
    %c0_i32 = arith.constant 0 : i32
    %c0_i32_0 = arith.constant 0 : i32
    return %arg0, %c0_i32 : i32, i32
  }
}

</mosaic_0001>

<bundles_post_ra>
// kernel: tpu_custom_call.1
= control target key start
LH: loop header
LB: loop body
LE: loop exit
PB: predicated region body
PF: predicated region fallthrough
CT: control target
= control target key end

     0   :  { %10 = vsyncpa [#allocation4], 0  ;;  %s698_s0 = inlined_call_operand.hbm [shape: bf16[16,128], index: 0, kind: input, shape index: {}]   ;;  %s699_s1 = inlined_call_operand.hbm [shape: bf16[128,256], index: 1, kind: input, shape index: {}]   ;;  %s700_s2 = inlined_call_operand.vmem [shape: f32[1,256], index: 2, kind: input, shape index: {}]   ;;  %s701_s3 = inlined_call_operand.hbm [shape: bf16[256,128], index: 3, kind: input, shape index: {}]   ;;  %s702_s4 = inlined_call_operand.vmem [shape: f32[1,128], index: 4, kind: input, shape index: {}]   ;;  %s703_s5 = inlined_call_operand.hbm [shape: f32[16,128], index: 5, kind: output, shape index: {}]  }
   0x1   :  { %11 = vsyncpa [#allocation7], 0 }
   0x2   :  { %12 = vsyncpa [#allocation5], 0  ;;  %s635_s18 = smov [#allocation6]  }
   0x3   :  { %s30_s19 = sshll.u32 %s635_s18, 4  ;;  %s31_s19 = int_to_ptr.vmem [resolvable:$true] %s30_s19 }
   0x4   :  { %s557_s20 = scalar_lea.vmem %s31_s19, 2048  ;;  %p562_p1 = scmp.lt.s32.totalorder %s31_s19, %s31_s19 }
   0x5   :  { %p558_p0 = scmp.ne.s32.totalorder %s31_s19, %s557_s20  ;;  %p563_p2 = scmp.lt.s32.totalorder %s557_s20, %s557_s20 }
   0x7   :  { %p564_p3 = por %p563_p2, %p562_p1 }
   0x9   :  { %p565_p4 = pnand %p564_p3, %p558_p0 }
   0xb   :  { %568 = shalt.err (!%p565_p4)
}
   0xc   :  { %s636_s21 = smov 128   ;;  %s637_s22 = smov 8  }
   0xd   :  { %36 = dma.hbm_to_vmem [thread:$0]  %s699_s1, 2048, %s31_s19, [#allocation7], %s636_s21, %s636_s21, %s637_s22  }
   0xe   :  { %s638_s25 = smov [#allocation3]  }
   0xf   :  { %s18_s26 = sshll.u32 %s638_s25, 4  ;;  %s19_s26 = int_to_ptr.vmem [resolvable:$true] %s18_s26 }
  0x10   :  { %s577_s27 = scalar_lea.vmem %s19_s26, 128  ;;  %p582_p6 = scmp.lt.s32.totalorder %s19_s26, %s19_s26 }
  0x11   :  { %p578_p5 = scmp.ne.s32.totalorder %s19_s26, %s577_s27  ;;  %p583_p7 = scmp.lt.s32.totalorder %s577_s27, %s577_s27 }
  0x13   :  { %p584_p8 = por %p583_p7, %p582_p6 }
  0x15   :  { %p585_p9 = pnand %p584_p8, %p578_p5 }
  0x17   :  { %588 = shalt.err (!%p585_p9)
}
  0x18   :  { %s639_s28 = smov 64   ;;  %s640_s29 = smov 4  }
  0x19   :  { %24 = dma.hbm_to_vmem [thread:$0]  %s698_s0, 128, %s19_s26, [#allocation4], %s639_s28, %s639_s28, %s640_s29  }
  0x1a   :  { %s641_s7 = smov [#allocation8]  }
  0x1b   :  { %s44_s8 = sshll.u32 %s641_s7, 4  ;;  %s45_s8 = int_to_ptr.vmem [resolvable:$true] %s44_s8 }
  0x1c   :  { %s597_s1 = scalar_lea.vmem %s45_s8, 2048  ;;  %p602_p11 = scmp.lt.s32.totalorder %s45_s8, %s45_s8 }
  0x1d   :  { %p598_p10 = scmp.ne.s32.totalorder %s45_s8, %s597_s1  ;;  %p603_p12 = scmp.lt.s32.totalorder %s597_s1, %s597_s1 }
  0x1f   :  { %p604_p13 = por %p603_p12, %p602_p11 }
  0x21   :  { %p605_p0 = pnand %p604_p13, %p598_p10 }
  0x23   :  { %608 = shalt.err (!%p605_p0)
}
  0x24   :  { %50 = dma.hbm_to_vmem [thread:$0]  %s701_s3, 2048, %s45_s8, [#allocation7], %s639_s28, %s639_s28, %s640_s29  }
  0x25   :  { %629 = dma.done.wait [#allocation4], 128  }
  0x26   :  { %630 = vsyncadd [#allocation4], 4294967168 }
  0x27   :  { %631 = dma.done.wait [#allocation7], 4096  }
  0x28   :  { %632 = vsyncadd [#allocation7], 4294963200  ;;  %v642_v0 = vmov 0   ;;  %v508_v1 = vld [vmem:[#allocation6 + $0x74] ss:$8 sps:$4 sm:$0xff]   ;;  %v537_v16 = vld [vmem:[#allocation8 + $0x68] sm:$0xff]   ;;  %v89_v34 = vlaneseq }
  0x29   :  { %217 = vmatprep.mubr.bf16.mxu0 %v642_v0  ;;  %v510_v2 = vld [vmem:[#allocation6 + $0x70] ss:$8 sps:$4 sm:$0xff]   ;;  %185 = vmatprep.subr.bf16.mxu0 %v508_v1  ;;  %v511_v3 = vld [vmem:[#allocation6 + $0x64] ss:$8 sps:$4 sm:$0xff]   ;;  %v513_v4 = vld [vmem:[#allocation6 + $0x60] ss:$8 sps:$4 sm:$0xff]  }
  0x2a   :  { %186 = vmatpush1.bf16.msra.mxu0 %v510_v2  ;;  %v514_v5 = vld [vmem:[#allocation6 + $0x54] ss:$8 sps:$4 sm:$0xff]   ;;  %v516_v6 = vld [vmem:[#allocation6 + $0x50] ss:$8 sps:$4 sm:$0xff]   ;;  %v517_v7 = vld [vmem:[#allocation6 + $0x44] ss:$8 sps:$4 sm:$0xff]  }
  0x2b   :  { %187 = vmatprep.subr.bf16.mxu0 %v511_v3  ;;  %v519_v8 = vld [vmem:[#allocation6 + $0x40] ss:$8 sps:$4 sm:$0xff]   ;;  %v520_v9 = vld [vmem:[#allocation6 + $0x34] ss:$8 sps:$4 sm:$0xff]   ;;  %v522_v11 = vld [vmem:[#allocation6 + $0x30] ss:$8 sps:$4 sm:$0xff]  }
  0x2c   :  { %v533_v10 = vld [vmem:[#allocation8 + $0x78] sm:$0xff]   ;;  %v523_v13 = vld [vmem:[#allocation6 + $0x24] ss:$8 sps:$4 sm:$0xff]   ;;  %v535_v14 = vld [vmem:[#allocation8 + $0x70] sm:$0xff]   ;;  %v90_v35 = vshrl.u32 %v89_v34, 7  ;;  %s643_s12 = smov [#allocation9]  }
  0x2d   :  { %v534_v12 = vld [vmem:[#allocation8 + $0x38] sm:$0xff]   ;;  %477 = vmatprep.subr.bf16.mxu1 %v533_v10  ;;  %v536_v15 = vld [vmem:[#allocation8 + $0x30] sm:$0xff]   ;;  %v525_v17 = vld [vmem:[#allocation6 + $0x20] ss:$8 sps:$4 sm:$0xff]   ;;  %s430_s13 = sshll.u32 %s643_s12, 4  ;;  %s431_s13 = int_to_ptr.vmem [resolvable:$true] %s430_s13 }
  0x2e   :  { %188 = vmatpush1.bf16.msra.mxu0 %v513_v4  ;;  %478 = vmatpush3.bf16.msra.mxu1 %v534_v12  ;;  %v526_v18 = vld [vmem:[#allocation6 + $0x14] ss:$8 sps:$4 sm:$0xff]   ;;  %v538_v19 = vld [vmem:[#allocation8 + $0x28] sm:$0xff]   ;;  %v539_v20 = vld [vmem:[#allocation8 + $0x60] sm:$0xff]   ;;  %v95_v36 = vsub.s32 1, %v90_v35  ;;  %v91_v37 = vsub.s32 0, %v90_v35  ;;  %p614_p2 = scmp.lt.s32.totalorder %s431_s13, %s431_s13 }
  0x2f   :  { %189 = vmatprep.subr.bf16.mxu0 %v514_v5  ;;  %479 = vmatprep.subr.bf16.mxu1 %v535_v14  ;;  %v528_v21 = vld [vmem:[#allocation6 + $0x10] ss:$8 sps:$4 sm:$0xff]   ;;  %v540_v22 = vld [vmem:[#allocation8 + $0x20] sm:$0xff]   ;;  %v545_v30 = vld [vmem:[#allocation8 + $0x48] sm:$0xff]   ;;  %s609_s14 = scalar_lea.vmem %s431_s13, 256 }
  0x30   :  { %v529_v23 = vld [vmem:[#allocation6 + $0x4] ss:$8 sps:$4 sm:$0xff]   ;;  %v541_v24 = vld [vmem:[#allocation8 + $0x58] sm:$0xff]   ;;  %v531_v25 = vld [vmem:[#allocation6] ss:$8 sps:$4 sm:$0xff]   ;;  %p610_p1 = scmp.ne.s32.totalorder %s431_s13, %s609_s14  ;;  %p615_p3 = scmp.lt.s32.totalorder %s609_s14, %s609_s14 }
  0x31   :  { %v542_v26 = vld [vmem:[#allocation8 + $0x18] sm:$0xff]   ;;  %v543_v28 = vld [vmem:[#allocation8 + $0x50] sm:$0xff]   ;;  %v546_v31 = vld [vmem:[#allocation8 + $0x8] sm:$0xff]  }
  0x32   :  { %190 = vmatpush1.bf16.msra.mxu0 %v516_v6  ;;  %480 = vmatpush3.bf16.msra.mxu1 %v536_v15  ;;  %v532_v27 = vld [vmem:[#allocation3] sm:$0xff]   ;;  %v544_v29 = vld [vmem:[#allocation8 + $0x10] sm:$0xff]   ;;  %v547_v32 = vld [vmem:[#allocation8 + $0x40] sm:$0xff]   ;;  %p616_p4 = por %p615_p3, %p614_p2 }
  0x33   :  { %191 = vmatprep.subr.bf16.mxu0 %v517_v7  ;;  %481 = vmatprep.subr.bf16.mxu1 %v537_v16  ;;  %v548_v33 = vld [vmem:[#allocation8] sm:$0xff]   ;;  %v87_v38 = vld [vmem:[%s700_s2] sm:$0x3] }
  0x34   :  { %v96_v40 = vrot.slane %v87_v38, %v95_v36  ;;  %v92_v41 = vrot.slane %v87_v38, %v91_v37  ;;  %v476_v57 = vld [vmem:[%s702_s4] ss:$0 sm:$0xff]  ;;  %p617_p5 = pnand %p616_p4, %p610_p1 }
  0x36   :  { %192 = vmatpush1.bf16.msra.mxu0 %v519_v8  ;;  %482 = vmatpush3.bf16.msra.mxu1 %v538_v19 }
  0x37   :  { %193 = vmatprep.subr.bf16.mxu0 %v520_v9  ;;  %483 = vmatprep.subr.bf16.mxu1 %v539_v20 }
  0x3a   :  { %194 = vmatpush1.bf16.msra.mxu0 %v522_v11  ;;  %484 = vmatpush3.bf16.msra.mxu1 %v540_v22 }
  0x3b   :  { %195 = vmatprep.subr.bf16.mxu0 %v523_v13  ;;  %485 = vmatprep.subr.bf16.mxu1 %v541_v24 }
  0x3e   :  { %196 = vmatpush1.bf16.msra.mxu0 %v525_v17  ;;  %486 = vmatpush3.bf16.msra.mxu1 %v542_v26 }
  0x3f   :  { %197 = vmatprep.subr.bf16.mxu0 %v526_v18  ;;  %487 = vmatprep.subr.bf16.mxu1 %v543_v28 }
  0x42   :  { %198 = vmatpush1.bf16.msra.mxu0 %v528_v21  ;;  %488 = vmatpush3.bf16.msra.mxu1 %v544_v29 }
  0x43   :  { %199 = vmatprep.subr.bf16.mxu0 %v529_v23  ;;  %489 = vmatprep.subr.bf16.mxu1 %v545_v30 }
  0x46   :  { %200 = vmatpush1.bf16.msra.mxu0 %v531_v25  ;;  %490 = vmatpush3.bf16.msra.mxu1 %v546_v31 }
  0x47   :  { %491 = vmatprep.subr.bf16.mxu1 %v547_v32 }
  0x49   :  { %218 = vmatmul.mubr.bf16.vlgmr.msra.gmra.mxu0 %v532_v27 }
  0x4a   :  { %492 = vmatpush3.bf16.msra.mxu1 %v548_v33 }
 0x109   :  { %v219_v39 = vpop.f32.mrf.mxu0 }
 0x10a   :  { %v220_v46 = vadd.f32 %v219_v39, %v92_v41 }
 0x10b   :  { %v221_v42 = vpop.f32.mrf.mxu0 }
 0x10c   :  { %v222_v44 = vadd.f32 %v221_v42, %v96_v40  ;;  %v228_v52 = vmax.f32 %v220_v46, 0.0 }
 0x10d   :  { %v223_v43 = vpop.f32.mrf.mxu0 }
 0x10e   :  { %v224_v45 = vadd.f32 %v223_v43, %v92_v41  ;;  %v229_v50 = vmax.f32 %v222_v44, 0.0 }
 0x10f   :  { %v225_v47 = vpop.f32.mrf.mxu0 }
 0x110   :  { %v226_v48 = vadd.f32 %v225_v47, %v96_v40  ;;  %v230_v49 = vmax.f32 %v224_v45, 0.0 }
 0x112   :  { %v231_v51 = vmax.f32 %v226_v48, 0.0  ;;  %v234_v54 = vpack.c.bf16 %v230_v49, %v228_v52 }
 0x114   :  { %v235_v53 = vpack.c.bf16 %v231_v51, %v229_v50 }
 0x116   :  { %396 = vmatprep.mubr.bf16.mxu1 %v235_v53 }
 0x117   :  { %397 = vmatmul.mubr.bf16.vlgmr.msra.gmra.mxu1 %v234_v54 }
 0x1d7   :  { %v493_v55 = vpop.f32.mrf.mxu1 }
 0x1d9   :  { %v494_v56 = vpop.f32.mrf.mxu1 }
 0x1da   :  { %v495_v58 = vadd.f32 %v494_v56, %v493_v55 }
 0x1db   :  { %v496_v59 = vpop.f32.mrf.mxu1 }
 0x1dc   :  { %v421_v60 = vadd.f32 %v495_v58, %v476_v57 }
 0x1dd   :  { %v497_v61 = vpop.f32.mrf.mxu1 }
 0x1de   :  { %423 = vst [vmem:[#allocation9] sm:$0xff] %v421_v60  ;;  %v498_v62 = vadd.f32 %v497_v61, %v496_v59 }
 0x1e0   :  { %v422_v63 = vadd.f32 %v498_v62, %v476_v57 }
 0x1e2   :  { %424 = vst [vmem:[#allocation9 + $0x8] sm:$0xff] %v422_v63 }
 0x1e3   :  { %620 = shalt.err (!%p617_p5)
}
 0x1e4   :  { %436 = dma.vmem_to_hbm [thread:$0]  %s431_s13, 256, %s703_s5, [#allocation5], %s636_s21, %s636_s21, %s637_s22  }
 0x1e5   :  { %633 = dma.done.wait [#allocation5], 256  }
 0x1e6   :  { %634 = vsyncadd [#allocation5], 4294967040 }
 0x1e7   :  { %440 = vsyncpa [#allocation4], 1 }
 0x1e8   :  { %441 = vsyncpa [#allocation7], 1 }
 0x1e9   :  { %442 = vsyncpa [#allocation5], 1 }

</bundles_post_ra>
